<compile_context>
chip_gen: v7x
topology: tpu7x:2x2x1
jax: 0.10.0
libtpu: 0.0.40
codegen_flags: <defaults>
</compile_context>

<pallas_src>
import functools

import jax
import jax.numpy as jnp
from jax.experimental import pallas as pl
from jax.experimental.pallas import tpu as pltpu


def _spatial_scan_kernel(x_ref, alpha_ref, o_ref, state_ref, *, block_t, reverse):
    """One grid step of the spatial recurrence.

    x_ref:     (tT, tR, tL)  input tile (T = scan axis, leading)
    alpha_ref: (tR, 1)       per-row decay (resident across the T sweep)
    o_ref:     (tT, tR, tL)  output tile
    state_ref: (tR, tL)      carried recurrence state (VMEM scratch across T blocks)
    """
    # First T block of each (R, L) tile: reset the carried state.
    @pl.when(pl.program_id(2) == 0)
    def _():
        state_ref[...] = jnp.zeros_like(state_ref)

    alpha = alpha_ref[...]          # (tR, 1) -> broadcasts over lanes
    state = state_ref[...]          # (tR, tL)

    steps = range(block_t - 1, -1, -1) if reverse else range(block_t)
    for t in steps:                 # small static trip count -> fully unrolled for the scheduler
        state = jnp.maximum(alpha * state + x_ref[t], 0.0)
        o_ref[t] = state

    state_ref[...] = state          # carry into the next T block


def _pick_block(dim, target, align=1):
    """Largest block <= target that divides dim and is a multiple of align,
    falling back to the full dim (always a legal Pallas block size)."""
    if dim <= target:
        return dim
    for cand in range(target, 0, -1):
        if dim % cand == 0 and cand % align == 0:
            return cand
    return dim


def spatial_rnn_pallas(x, alpha, direction="right",
                       block_t=16, block_r=64, block_l=512):
    """x: (N, C, H, W) float32 NCHW, alpha: (C,) float32."""
    N, C, H, W = x.shape
    if direction not in ("right", "left", "down", "up"):
        raise KeyError("Invalid direction in SpatialRNN!")

    reverse = direction in ("left", "up")

    # Present the tensor as (T, R, L): scan axis leading, N*C on sublanes, other spatial dim on lanes.
    if direction in ("right", "left"):
        xt = jnp.transpose(x, (3, 0, 1, 2))     # (W, N, C, H)
        T, L = W, H
    else:
        xt = jnp.transpose(x, (2, 0, 1, 3))     # (H, N, C, W)
        T, L = H, W
    R = N * C
    xk = xt.reshape(T, R, L).astype(jnp.float32)

    # Per-row decay: row r = n*C + c -> alpha[c].  Tiny (R, 1) array, resident across the sweep.
    alpha_r = jnp.tile(alpha.astype(jnp.float32), (N,)).reshape(R, 1)

    tT = _pick_block(T, block_t, align=1)
    tR = _pick_block(R, block_r, align=8)
    tL = _pick_block(L, block_l, align=128)
    n_tb = T // tT

    if reverse:
        x_map = lambda i, j, k: (n_tb - 1 - k, i, j)   # walk T blocks backwards; output stays in place
    else:
        x_map = lambda i, j, k: (k, i, j)
    a_map = lambda i, j, k: (i, 0)

    kernel = functools.partial(_spatial_scan_kernel, block_t=tT, reverse=reverse)

    out = pl.pallas_call(
        kernel,
        out_shape=jax.ShapeDtypeStruct((T, R, L), jnp.float32),
        grid_spec=pltpu.PrefetchScalarGridSpec(
            num_scalar_prefetch=0,
            grid=(R // tR, L // tL, n_tb),
            in_specs=[
                pl.BlockSpec((tT, tR, tL), x_map),
                pl.BlockSpec((tR, 1), a_map),
            ],
            out_specs=pl.BlockSpec((tT, tR, tL), x_map),
            scratch_shapes=[pltpu.VMEM((tR, tL), jnp.float32)],
        ),
        compiler_params=pltpu.CompilerParams(
            dimension_semantics=("parallel", "parallel", "arbitrary"),
            vmem_limit_bytes=32 * 1024 * 1024,
        ),
    )(xk, alpha_r)

    out = out.reshape(T, N, C, L)
    if direction in ("right", "left"):
        return jnp.transpose(out, (1, 2, 3, 0))   # (N, C, H, W)
    return jnp.transpose(out, (1, 2, 0, 3))       # (N, C, H, W)


def spatial_rnn_ref(x, alpha, direction="right"):
    """Pure-JAX reference matching the PyTorch forward exactly."""
    N, C, H, W = x.shape
    a = alpha[None, :, None]
    if direction == "right":
        outs = [jnp.maximum(x[:, :, :, 0], 0.0)]
        for i in range(1, W):
            outs.append(jnp.maximum(a * outs[i - 1] + x[:, :, :, i], 0.0))
        return jnp.stack(outs, axis=3)
    if direction == "left":
        outs = [jnp.maximum(x[:, :, :, -1], 0.0)]
        for i in range(1, W):
            outs.append(jnp.maximum(a * outs[i - 1] + x[:, :, :, -i - 1], 0.0))
        outs.reverse()
        return jnp.stack(outs, axis=3)
    if direction == "down":
        outs = [jnp.maximum(x[:, :, 0, :], 0.0)]
        for i in range(1, H):
            outs.append(jnp.maximum(a * outs[i - 1] + x[:, :, i, :], 0.0))
        return jnp.stack(outs, axis=2)
    if direction == "up":
        outs = [jnp.maximum(x[:, :, -1, :], 0.0)]
        for i in range(1, H):
            outs.append(jnp.maximum(a * outs[i - 1] + x[:, :, -i - 1, :], 0.0))
        outs.reverse()
        return jnp.stack(outs, axis=2)
    raise KeyError("Invalid direction in SpatialRNN!")


if __name__ == "__main__":
    key = jax.random.PRNGKey(0)
    k1, k2 = jax.random.split(key)

    ok = True

    # Small NCHW test (module's expected layout).
    N, C, H, W = 2, 4, 16, 16
    x = jax.random.normal(k1, (N, C, H, W), dtype=jnp.float32)
    alpha = 0.5 + 0.1 * jnp.arange(C, dtype=jnp.float32)
    for direction in ("right", "left", "down", "up"):
        out = jax.block_until_ready(spatial_rnn_pallas(x, alpha, direction=direction))
        ref = spatial_rnn_ref(x, alpha, direction=direction)
        if not jnp.allclose(out, ref, atol=1e-5, rtol=1e-5):
            ok = False
            print(f"MISMATCH shape1 direction={direction}")

    # Second shape exercises multi-block T streaming (incl. reversed block order for left/up)
    # and non-(8,128)-aligned R/L handled via full-dim blocks.
    N2, C2, H2, W2 = 1, 5, 16, 48
    x2 = jax.random.normal(k2, (N2, C2, H2, W2), dtype=jnp.float32)
    alpha2 = 0.3 + 0.12 * jnp.arange(C2, dtype=jnp.float32)
    for direction in ("right", "left", "down", "up"):
        out = jax.block_until_ready(
            spatial_rnn_pallas(x2, alpha2, direction=direction, block_t=8))
        ref = spatial_rnn_ref(x2, alpha2, direction=direction)
        if not jnp.allclose(out, ref, atol=1e-5, rtol=1e-5):
            ok = False
            print(f"MISMATCH shape2 direction={direction}")

    if ok:
        print("KERNEL_OK")
</pallas_src>

<mosaic_0001>
module attributes {stable_mosaic.version = 11 : i64} {
  func.func @_spatial_scan_kernel(%arg0: i32, %arg1: i32, %arg2: i32, %arg3: memref<16x8x16xf32, #tpu.memory_space<vmem>>, %arg4: memref<8x1xf32, #tpu.memory_space<vmem>>, %arg5: memref<16x8x16xf32, #tpu.memory_space<vmem>>, %arg6: memref<8x16xf32, #tpu.memory_space<vmem>>) attributes {dimension_semantics = [#tpu.dimension_semantics<parallel>, #tpu.dimension_semantics<parallel>, #tpu.dimension_semantics<arbitrary>], iteration_bounds = array<i64: 1, 1, 1>, scalar_prefetch = 0 : i64, scratch_operands = 1 : i64, tpu.core_type = #tpu.core_type<tc>, window_params = [{transform_indices = @transform_0, window_bounds = array<i64: 16, 8, 16>}, {transform_indices = @transform_1, window_bounds = array<i64: 8, 1>}, {transform_indices = @transform_2, window_bounds = array<i64: 16, 8, 16>}]} {
    %c0_i32 = arith.constant 0 : i32
    %0 = arith.cmpi eq, %arg2, %c0_i32 : i32
    %1 = arith.extui %0 : i1 to i32
    %c0_i32_0 = arith.constant 0 : i32
    %2 = arith.cmpi ne, %1, %c0_i32_0 : i32
    scf.if %2 {
      %cst_102 = arith.constant 0.000000e+00 : f32
      %166 = vector.broadcast %cst_102 : f32 to vector<8x16xf32>
      %c0_103 = arith.constant 0 : index
      %c0_104 = arith.constant 0 : index
      %167 = vector.load %arg6[%c0_103, %c0_104] : memref<8x16xf32, #tpu.memory_space<vmem>>, vector<8x16xf32>
      tpu.vector_store %arg6[%c0_103, %c0_104], %166 {strides = array<i32>} : memref<8x16xf32, #tpu.memory_space<vmem>>, vector<8x16xf32>,
    } else {
    }
    %c0 = arith.constant 0 : index
    %c0_1 = arith.constant 0 : index
    %3 = vector.load %arg4[%c0, %c0_1] : memref<8x1xf32, #tpu.memory_space<vmem>>, vector<8x1xf32>
    %c0_2 = arith.constant 0 : index
    %c0_3 = arith.constant 0 : index
    %4 = vector.load %arg6[%c0_2, %c0_3] : memref<8x16xf32, #tpu.memory_space<vmem>>, vector<8x16xf32>
    %5 = vector.broadcast %3 : vector<8x1xf32> to vector<8x16xf32>
    %6 = arith.mulf %5, %4 : vector<8x16xf32>
    %c0_4 = arith.constant 0 : index
    %c0_5 = arith.constant 0 : index
    %c0_6 = arith.constant 0 : index
    %7 = vector.load %arg3[%c0_4, %c0_5, %c0_6] : memref<16x8x16xf32, #tpu.memory_space<vmem>>, vector<1x8x16xf32>
    %8 = vector.shape_cast %7 : vector<1x8x16xf32> to vector<8x16xf32>
    %9 = arith.addf %6, %8 : vector<8x16xf32>
    %cst = arith.constant 0.000000e+00 : f32
    %10 = vector.broadcast %cst : f32 to vector<8x16xf32>
    %11 = arith.maximumf %9, %10 : vector<8x16xf32>
    %c0_7 = arith.constant 0 : index
    %c0_8 = arith.constant 0 : index
    %c0_9 = arith.constant 0 : index
    %12 = vector.load %arg5[%c0_7, %c0_8, %c0_9] : memref<16x8x16xf32, #tpu.memory_space<vmem>>, vector<1x8x16xf32>
    %13 = vector.shape_cast %12 : vector<1x8x16xf32> to vector<8x16xf32>
    %14 = vector.shape_cast %11 : vector<8x16xf32> to vector<1x8x16xf32>
    tpu.vector_store %arg5[%c0_7, %c0_8, %c0_9], %14 {strides = array<i32>} : memref<16x8x16xf32, #tpu.memory_space<vmem>>, vector<1x8x16xf32>,
    %15 = vector.broadcast %3 : vector<8x1xf32> to vector<8x16xf32>
    %16 = arith.mulf %15, %11 : vector<8x16xf32>
    %c1 = arith.constant 1 : index
    %c0_10 = arith.constant 0 : index
    %c0_11 = arith.constant 0 : index
    %17 = vector.load %arg3[%c1, %c0_10, %c0_11] : memref<16x8x16xf32, #tpu.memory_space<vmem>>, vector<1x8x16xf32>
    %18 = vector.shape_cast %17 : vector<1x8x16xf32> to vector<8x16xf32>
    %19 = arith.addf %16, %18 : vector<8x16xf32>
    %cst_12 = arith.constant 0.000000e+00 : f32
    %20 = vector.broadcast %cst_12 : f32 to vector<8x16xf32>
    %21 = arith.maximumf %19, %20 : vector<8x16xf32>
    %c1_13 = arith.constant 1 : index
    %c0_14 = arith.constant 0 : index
    %c0_15 = arith.constant 0 : index
    %22 = vector.load %arg5[%c1_13, %c0_14, %c0_15] : memref<16x8x16xf32, #tpu.memory_space<vmem>>, vector<1x8x16xf32>
    %23 = vector.shape_cast %22 : vector<1x8x16xf32> to vector<8x16xf32>
    %24 = vector.shape_cast %21 : vector<8x16xf32> to vector<1x8x16xf32>
    tpu.vector_store %arg5[%c1_13, %c0_14, %c0_15], %24 {strides = array<i32>} : memref<16x8x16xf32, #tpu.memory_space<vmem>>, vector<1x8x16xf32>,
    %25 = vector.broadcast %3 : vector<8x1xf32> to vector<8x16xf32>
    %26 = arith.mulf %25, %21 : vector<8x16xf32>
    %c2 = arith.constant 2 : index
    %c0_16 = arith.constant 0 : index
    %c0_17 = arith.constant 0 : index
    %27 = vector.load %arg3[%c2, %c0_16, %c0_17] : memref<16x8x16xf32, #tpu.memory_space<vmem>>, vector<1x8x16xf32>
    %28 = vector.shape_cast %27 : vector<1x8x16xf32> to vector<8x16xf32>
    %29 = arith.addf %26, %28 : vector<8x16xf32>
    %cst_18 = arith.constant 0.000000e+00 : f32
    %30 = vector.broadcast %cst_18 : f32 to vector<8x16xf32>
    %31 = arith.maximumf %29, %30 : vector<8x16xf32>
    %c2_19 = arith.constant 2 : index
    %c0_20 = arith.constant 0 : index
    %c0_21 = arith.constant 0 : index
    %32 = vector.load %arg5[%c2_19, %c0_20, %c0_21] : memref<16x8x16xf32, #tpu.memory_space<vmem>>, vector<1x8x16xf32>
    %33 = vector.shape_cast %32 : vector<1x8x16xf32> to vector<8x16xf32>
    %34 = vector.shape_cast %31 : vector<8x16xf32> to vector<1x8x16xf32>
    tpu.vector_store %arg5[%c2_19, %c0_20, %c0_21], %34 {strides = array<i32>} : memref<16x8x16xf32, #tpu.memory_space<vmem>>, vector<1x8x16xf32>,
    %35 = vector.broadcast %3 : vector<8x1xf32> to vector<8x16xf32>
    %36 = arith.mulf %35, %31 : vector<8x16xf32>
    %c3 = arith.constant 3 : index
    %c0_22 = arith.constant 0 : index
    %c0_23 = arith.constant 0 : index
    %37 = vector.load %arg3[%c3, %c0_22, %c0_23] : memref<16x8x16xf32, #tpu.memory_space<vmem>>, vector<1x8x16xf32>
    %38 = vector.shape_cast %37 : vector<1x8x16xf32> to vector<8x16xf32>
    %39 = arith.addf %36, %38 : vector<8x16xf32>
    %cst_24 = arith.constant 0.000000e+00 : f32
    %40 = vector.broadcast %cst_24 : f32 to vector<8x16xf32>
    %41 = arith.maximumf %39, %40 : vector<8x16xf32>
    %c3_25 = arith.constant 3 : index
    %c0_26 = arith.constant 0 : index
    %c0_27 = arith.constant 0 : index
    %42 = vector.load %arg5[%c3_25, %c0_26, %c0_27] : memref<16x8x16xf32, #tpu.memory_space<vmem>>, vector<1x8x16xf32>
    %43 = vector.shape_cast %42 : vector<1x8x16xf32> to vector<8x16xf32>
    %44 = vector.shape_cast %41 : vector<8x16xf32> to vector<1x8x16xf32>
    tpu.vector_store %arg5[%c3_25, %c0_26, %c0_27], %44 {strides = array<i32>} : memref<16x8x16xf32, #tpu.memory_space<vmem>>, vector<1x8x16xf32>,
    %45 = vector.broadcast %3 : vector<8x1xf32> to vector<8x16xf32>
    %46 = arith.mulf %45, %41 : vector<8x16xf32>
    %c4 = arith.constant 4 : index
    %c0_28 = arith.constant 0 : index
    %c0_29 = arith.constant 0 : index
    %47 = vector.load %arg3[%c4, %c0_28, %c0_29] : memref<16x8x16xf32, #tpu.memory_space<vmem>>, vector<1x8x16xf32>
    %48 = vector.shape_cast %47 : vector<1x8x16xf32> to vector<8x16xf32>
    %49 = arith.addf %46, %48 : vector<8x16xf32>
    %cst_30 = arith.constant 0.000000e+00 : f32
    %50 = vector.broadcast %cst_30 : f32 to vector<8x16xf32>
    %51 = arith.maximumf %49, %50 : vector<8x16xf32>
    %c4_31 = arith.constant 4 : index
    %c0_32 = arith.constant 0 : index
    %c0_33 = arith.constant 0 : index
    %52 = vector.load %arg5[%c4_31, %c0_32, %c0_33] : memref<16x8x16xf32, #tpu.memory_space<vmem>>, vector<1x8x16xf32>
    %53 = vector.shape_cast %52 : vector<1x8x16xf32> to vector<8x16xf32>
    %54 = vector.shape_cast %51 : vector<8x16xf32> to vector<1x8x16xf32>
    tpu.vector_store %arg5[%c4_31, %c0_32, %c0_33], %54 {strides = array<i32>} : memref<16x8x16xf32, #tpu.memory_space<vmem>>, vector<1x8x16xf32>,
    %55 = vector.broadcast %3 : vector<8x1xf32> to vector<8x16xf32>
    %56 = arith.mulf %55, %51 : vector<8x16xf32>
    %c5 = arith.constant 5 : index
    %c0_34 = arith.constant 0 : index
    %c0_35 = arith.constant 0 : index
    %57 = vector.load %arg3[%c5, %c0_34, %c0_35] : memref<16x8x16xf32, #tpu.memory_space<vmem>>, vector<1x8x16xf32>
    %58 = vector.shape_cast %57 : vector<1x8x16xf32> to vector<8x16xf32>
    %59 = arith.addf %56, %58 : vector<8x16xf32>
    %cst_36 = arith.constant 0.000000e+00 : f32
    %60 = vector.broadcast %cst_36 : f32 to vector<8x16xf32>
    %61 = arith.maximumf %59, %60 : vector<8x16xf32>
    %c5_37 = arith.constant 5 : index
    %c0_38 = arith.constant 0 : index
    %c0_39 = arith.constant 0 : index
    %62 = vector.load %arg5[%c5_37, %c0_38, %c0_39] : memref<16x8x16xf32, #tpu.memory_space<vmem>>, vector<1x8x16xf32>
    %63 = vector.shape_cast %62 : vector<1x8x16xf32> to vector<8x16xf32>
    %64 = vector.shape_cast %61 : vector<8x16xf32> to vector<1x8x16xf32>
    tpu.vector_store %arg5[%c5_37, %c0_38, %c0_39], %64 {strides = array<i32>} : memref<16x8x16xf32, #tpu.memory_space<vmem>>, vector<1x8x16xf32>,
    %65 = vector.broadcast %3 : vector<8x1xf32> to vector<8x16xf32>
    %66 = arith.mulf %65, %61 : vector<8x16xf32>
    %c6 = arith.constant 6 : index
    %c0_40 = arith.constant 0 : index
    %c0_41 = arith.constant 0 : index
    %67 = vector.load %arg3[%c6, %c0_40, %c0_41] : memref<16x8x16xf32, #tpu.memory_space<vmem>>, vector<1x8x16xf32>
    %68 = vector.shape_cast %67 : vector<1x8x16xf32> to vector<8x16xf32>
    %69 = arith.addf %66, %68 : vector<8x16xf32>
    %cst_42 = arith.constant 0.000000e+00 : f32
    %70 = vector.broadcast %cst_42 : f32 to vector<8x16xf32>
    %71 = arith.maximumf %69, %70 : vector<8x16xf32>
    %c6_43 = arith.constant 6 : index
    %c0_44 = arith.constant 0 : index
    %c0_45 = arith.constant 0 : index
    %72 = vector.load %arg5[%c6_43, %c0_44, %c0_45] : memref<16x8x16xf32, #tpu.memory_space<vmem>>, vector<1x8x16xf32>
    %73 = vector.shape_cast %72 : vector<1x8x16xf32> to vector<8x16xf32>
    %74 = vector.shape_cast %71 : vector<8x16xf32> to vector<1x8x16xf32>
    tpu.vector_store %arg5[%c6_43, %c0_44, %c0_45], %74 {strides = array<i32>} : memref<16x8x16xf32, #tpu.memory_space<vmem>>, vector<1x8x16xf32>,
    %75 = vector.broadcast %3 : vector<8x1xf32> to vector<8x16xf32>
    %76 = arith.mulf %75, %71 : vector<8x16xf32>
    %c7 = arith.constant 7 : index
    %c0_46 = arith.constant 0 : index
    %c0_47 = arith.constant 0 : index
    %77 = vector.load %arg3[%c7, %c0_46, %c0_47] : memref<16x8x16xf32, #tpu.memory_space<vmem>>, vector<1x8x16xf32>
    %78 = vector.shape_cast %77 : vector<1x8x16xf32> to vector<8x16xf32>
    %79 = arith.addf %76, %78 : vector<8x16xf32>
    %cst_48 = arith.constant 0.000000e+00 : f32
    %80 = vector.broadcast %cst_48 : f32 to vector<8x16xf32>
    %81 = arith.maximumf %79, %80 : vector<8x16xf32>
    %c7_49 = arith.constant 7 : index
    %c0_50 = arith.constant 0 : index
    %c0_51 = arith.constant 0 : index
    %82 = vector.load %arg5[%c7_49, %c0_50, %c0_51] : memref<16x8x16xf32, #tpu.memory_space<vmem>>, vector<1x8x16xf32>
    %83 = vector.shape_cast %82 : vector<1x8x16xf32> to vector<8x16xf32>
    %84 = vector.shape_cast %81 : vector<8x16xf32> to vector<1x8x16xf32>
    tpu.vector_store %arg5[%c7_49, %c0_50, %c0_51], %84 {strides = array<i32>} : memref<16x8x16xf32, #tpu.memory_space<vmem>>, vector<1x8x16xf32>,
    %85 = vector.broadcast %3 : vector<8x1xf32> to vector<8x16xf32>
    %86 = arith.mulf %85, %81 : vector<8x16xf32>
    %c8 = arith.constant 8 : index
    %c0_52 = arith.constant 0 : index
    %c0_53 = arith.constant 0 : index
    %87 = vector.load %arg3[%c8, %c0_52, %c0_53] : memref<16x8x16xf32, #tpu.memory_space<vmem>>, vector<1x8x16xf32>
    %88 = vector.shape_cast %87 : vector<1x8x16xf32> to vector<8x16xf32>
    %89 = arith.addf %86, %88 : vector<8x16xf32>
    %cst_54 = arith.constant 0.000000e+00 : f32
    %90 = vector.broadcast %cst_54 : f32 to vector<8x16xf32>
    %91 = arith.maximumf %89, %90 : vector<8x16xf32>
    %c8_55 = arith.constant 8 : index
    %c0_56 = arith.constant 0 : index
    %c0_57 = arith.constant 0 : index
    %92 = vector.load %arg5[%c8_55, %c0_56, %c0_57] : memref<16x8x16xf32, #tpu.memory_space<vmem>>, vector<1x8x16xf32>
    %93 = vector.shape_cast %92 : vector<1x8x16xf32> to vector<8x16xf32>
    %94 = vector.shape_cast %91 : vector<8x16xf32> to vector<1x8x16xf32>
    tpu.vector_store %arg5[%c8_55, %c0_56, %c0_57], %94 {strides = array<i32>} : memref<16x8x16xf32, #tpu.memory_space<vmem>>, vector<1x8x16xf32>,
    %95 = vector.broadcast %3 : vector<8x1xf32> to vector<8x16xf32>
    %96 = arith.mulf %95, %91 : vector<8x16xf32>
    %c9 = arith.constant 9 : index
    %c0_58 = arith.constant 0 : index
    %c0_59 = arith.constant 0 : index
    %97 = vector.load %arg3[%c9, %c0_58, %c0_59] : memref<16x8x16xf32, #tpu.memory_space<vmem>>, vector<1x8x16xf32>
    %98 = vector.shape_cast %97 : vector<1x8x16xf32> to vector<8x16xf32>
    %99 = arith.addf %96, %98 : vector<8x16xf32>
    %cst_60 = arith.constant 0.000000e+00 : f32
    %100 = vector.broadcast %cst_60 : f32 to vector<8x16xf32>
    %101 = arith.maximumf %99, %100 : vector<8x16xf32>
    %c9_61 = arith.constant 9 : index
    %c0_62 = arith.constant 0 : index
    %c0_63 = arith.constant 0 : index
    %102 = vector.load %arg5[%c9_61, %c0_62, %c0_63] : memref<16x8x16xf32, #tpu.memory_space<vmem>>, vector<1x8x16xf32>
    %103 = vector.shape_cast %102 : vector<1x8x16xf32> to vector<8x16xf32>
    %104 = vector.shape_cast %101 : vector<8x16xf32> to vector<1x8x16xf32>
    tpu.vector_store %arg5[%c9_61, %c0_62, %c0_63], %104 {strides = array<i32>} : memref<16x8x16xf32, #tpu.memory_space<vmem>>, vector<1x8x16xf32>,
    %105 = vector.broadcast %3 : vector<8x1xf32> to vector<8x16xf32>
    %106 = arith.mulf %105, %101 : vector<8x16xf32>
    %c10 = arith.constant 10 : index
    %c0_64 = arith.constant 0 : index
    %c0_65 = arith.constant 0 : index
    %107 = vector.load %arg3[%c10, %c0_64, %c0_65] : memref<16x8x16xf32, #tpu.memory_space<vmem>>, vector<1x8x16xf32>
    %108 = vector.shape_cast %107 : vector<1x8x16xf32> to vector<8x16xf32>
    %109 = arith.addf %106, %108 : vector<8x16xf32>
    %cst_66 = arith.constant 0.000000e+00 : f32
    %110 = vector.broadcast %cst_66 : f32 to vector<8x16xf32>
    %111 = arith.maximumf %109, %110 : vector<8x16xf32>
    %c10_67 = arith.constant 10 : index
    %c0_68 = arith.constant 0 : index
    %c0_69 = arith.constant 0 : index
    %112 = vector.load %arg5[%c10_67, %c0_68, %c0_69] : memref<16x8x16xf32, #tpu.memory_space<vmem>>, vector<1x8x16xf32>
    %113 = vector.shape_cast %112 : vector<1x8x16xf32> to vector<8x16xf32>
    %114 = vector.shape_cast %111 : vector<8x16xf32> to vector<1x8x16xf32>
    tpu.vector_store %arg5[%c10_67, %c0_68, %c0_69], %114 {strides = array<i32>} : memref<16x8x16xf32, #tpu.memory_space<vmem>>, vector<1x8x16xf32>,
    %115 = vector.broadcast %3 : vector<8x1xf32> to vector<8x16xf32>
    %116 = arith.mulf %115, %111 : vector<8x16xf32>
    %c11 = arith.constant 11 : index
    %c0_70 = arith.constant 0 : index
    %c0_71 = arith.constant 0 : index
    %117 = vector.load %arg3[%c11, %c0_70, %c0_71] : memref<16x8x16xf32, #tpu.memory_space<vmem>>, vector<1x8x16xf32>
    %118 = vector.shape_cast %117 : vector<1x8x16xf32> to vector<8x16xf32>
    %119 = arith.addf %116, %118 : vector<8x16xf32>
    %cst_72 = arith.constant 0.000000e+00 : f32
    %120 = vector.broadcast %cst_72 : f32 to vector<8x16xf32>
    %121 = arith.maximumf %119, %120 : vector<8x16xf32>
    %c11_73 = arith.constant 11 : index
    %c0_74 = arith.constant 0 : index
    %c0_75 = arith.constant 0 : index
    %122 = vector.load %arg5[%c11_73, %c0_74, %c0_75] : memref<16x8x16xf32, #tpu.memory_space<vmem>>, vector<1x8x16xf32>
    %123 = vector.shape_cast %122 : vector<1x8x16xf32> to vector<8x16xf32>
    %124 = vector.shape_cast %121 : vector<8x16xf32> to vector<1x8x16xf32>
    tpu.vector_store %arg5[%c11_73, %c0_74, %c0_75], %124 {strides = array<i32>} : memref<16x8x16xf32, #tpu.memory_space<vmem>>, vector<1x8x16xf32>,
    %125 = vector.broadcast %3 : vector<8x1xf32> to vector<8x16xf32>
    %126 = arith.mulf %125, %121 : vector<8x16xf32>
    %c12 = arith.constant 12 : index
    %c0_76 = arith.constant 0 : index
    %c0_77 = arith.constant 0 : index
    %127 = vector.load %arg3[%c12, %c0_76, %c0_77] : memref<16x8x16xf32, #tpu.memory_space<vmem>>, vector<1x8x16xf32>
    %128 = vector.shape_cast %127 : vector<1x8x16xf32> to vector<8x16xf32>
    %129 = arith.addf %126, %128 : vector<8x16xf32>
    %cst_78 = arith.constant 0.000000e+00 : f32
    %130 = vector.broadcast %cst_78 : f32 to vector<8x16xf32>
    %131 = arith.maximumf %129, %130 : vector<8x16xf32>
    %c12_79 = arith.constant 12 : index
    %c0_80 = arith.constant 0 : index
    %c0_81 = arith.constant 0 : index
    %132 = vector.load %arg5[%c12_79, %c0_80, %c0_81] : memref<16x8x16xf32, #tpu.memory_space<vmem>>, vector<1x8x16xf32>
    %133 = vector.shape_cast %132 : vector<1x8x16xf32> to vector<8x16xf32>
    %134 = vector.shape_cast %131 : vector<8x16xf32> to vector<1x8x16xf32>
    tpu.vector_store %arg5[%c12_79, %c0_80, %c0_81], %134 {strides = array<i32>} : memref<16x8x16xf32, #tpu.memory_space<vmem>>, vector<1x8x16xf32>,
    %135 = vector.broadcast %3 : vector<8x1xf32> to vector<8x16xf32>
    %136 = arith.mulf %135, %131 : vector<8x16xf32>
    %c13 = arith.constant 13 : index
    %c0_82 = arith.constant 0 : index
    %c0_83 = arith.constant 0 : index
    %137 = vector.load %arg3[%c13, %c0_82, %c0_83] : memref<16x8x16xf32, #tpu.memory_space<vmem>>, vector<1x8x16xf32>
    %138 = vector.shape_cast %137 : vector<1x8x16xf32> to vector<8x16xf32>
    %139 = arith.addf %136, %138 : vector<8x16xf32>
    %cst_84 = arith.constant 0.000000e+00 : f32
    %140 = vector.broadcast %cst_84 : f32 to vector<8x16xf32>
    %141 = arith.maximumf %139, %140 : vector<8x16xf32>
    %c13_85 = arith.constant 13 : index
    %c0_86 = arith.constant 0 : index
    %c0_87 = arith.constant 0 : index
    %142 = vector.load %arg5[%c13_85, %c0_86, %c0_87] : memref<16x8x16xf32, #tpu.memory_space<vmem>>, vector<1x8x16xf32>
    %143 = vector.shape_cast %142 : vector<1x8x16xf32> to vector<8x16xf32>
    %144 = vector.shape_cast %141 : vector<8x16xf32> to vector<1x8x16xf32>
    tpu.vector_store %arg5[%c13_85, %c0_86, %c0_87], %144 {strides = array<i32>} : memref<16x8x16xf32, #tpu.memory_space<vmem>>, vector<1x8x16xf32>,
    %145 = vector.broadcast %3 : vector<8x1xf32> to vector<8x16xf32>
    %146 = arith.mulf %145, %141 : vector<8x16xf32>
    %c14 = arith.constant 14 : index
    %c0_88 = arith.constant 0 : index
    %c0_89 = arith.constant 0 : index
    %147 = vector.load %arg3[%c14, %c0_88, %c0_89] : memref<16x8x16xf32, #tpu.memory_space<vmem>>, vector<1x8x16xf32>
    %148 = vector.shape_cast %147 : vector<1x8x16xf32> to vector<8x16xf32>
    %149 = arith.addf %146, %148 : vector<8x16xf32>
    %cst_90 = arith.constant 0.000000e+00 : f32
    %150 = vector.broadcast %cst_90 : f32 to vector<8x16xf32>
    %151 = arith.maximumf %149, %150 : vector<8x16xf32>
    %c14_91 = arith.constant 14 : index
    %c0_92 = arith.constant 0 : index
    %c0_93 = arith.constant 0 : index
    %152 = vector.load %arg5[%c14_91, %c0_92, %c0_93] : memref<16x8x16xf32, #tpu.memory_space<vmem>>, vector<1x8x16xf32>
    %153 = vector.shape_cast %152 : vector<1x8x16xf32> to vector<8x16xf32>
    %154 = vector.shape_cast %151 : vector<8x16xf32> to vector<1x8x16xf32>
    tpu.vector_store %arg5[%c14_91, %c0_92, %c0_93], %154 {strides = array<i32>} : memref<16x8x16xf32, #tpu.memory_space<vmem>>, vector<1x8x16xf32>,
    %155 = vector.broadcast %3 : vector<8x1xf32> to vector<8x16xf32>
    %156 = arith.mulf %155, %151 : vector<8x16xf32>
    %c15 = arith.constant 15 : index
    %c0_94 = arith.constant 0 : index
    %c0_95 = arith.constant 0 : index
    %157 = vector.load %arg3[%c15, %c0_94, %c0_95] : memref<16x8x16xf32, #tpu.memory_space<vmem>>, vector<1x8x16xf32>
    %158 = vector.shape_cast %157 : vector<1x8x16xf32> to vector<8x16xf32>
    %159 = arith.addf %156, %158 : vector<8x16xf32>
    %cst_96 = arith.constant 0.000000e+00 : f32
    %160 = vector.broadcast %cst_96 : f32 to vector<8x16xf32>
    %161 = arith.maximumf %159, %160 : vector<8x16xf32>
    %c15_97 = arith.constant 15 : index
    %c0_98 = arith.constant 0 : index
    %c0_99 = arith.constant 0 : index
    %162 = vector.load %arg5[%c15_97, %c0_98, %c0_99] : memref<16x8x16xf32, #tpu.memory_space<vmem>>, vector<1x8x16xf32>
    %163 = vector.shape_cast %162 : vector<1x8x16xf32> to vector<8x16xf32>
    %164 = vector.shape_cast %161 : vector<8x16xf32> to vector<1x8x16xf32>
    tpu.vector_store %arg5[%c15_97, %c0_98, %c0_99], %164 {strides = array<i32>} : memref<16x8x16xf32, #tpu.memory_space<vmem>>, vector<1x8x16xf32>,
    %c0_100 = arith.constant 0 : index
    %c0_101 = arith.constant 0 : index
    %165 = vector.load %arg6[%c0_100, %c0_101] : memref<8x16xf32, #tpu.memory_space<vmem>>, vector<8x16xf32>
    tpu.vector_store %arg6[%c0_100, %c0_101], %161 {strides = array<i32>} : memref<8x16xf32, #tpu.memory_space<vmem>>, vector<8x16xf32>,
    return
  }
  func.func @transform_0(%arg0: i32, %arg1: i32, %arg2: i32) -> (i32, i32, i32) {
    %c0_i32 = arith.constant 0 : i32
    return %arg2, %arg0, %arg1 : i32, i32, i32
  }
  func.func @transform_1(%arg0: i32, %arg1: i32, %arg2: i32) -> (i32, i32) {
    %c0_i32 = arith.constant 0 : i32
    %c0_i32_0 = arith.constant 0 : i32
    return %arg0, %c0_i32 : i32, i32
  }
  func.func @transform_2(%arg0: i32, %arg1: i32, %arg2: i32) -> (i32, i32, i32) {
    %c0_i32 = arith.constant 0 : i32
    return %arg2, %arg0, %arg1 : i32, i32, i32
  }
}

</mosaic_0001>

<bundles_post_ra>
// kernel: tpu_custom_call.1
= control target key start
LH: loop header
LB: loop body
LE: loop exit
PB: predicated region body
PF: predicated region fallthrough
CT: control target
= control target key end

     0   :  { %7 = vsyncpa [#allocation4], 0  ;;  %s313_s0 = inlined_call_operand.hbm [shape: f32[16,8,16], index: 0, kind: input, shape index: {}]   ;;  %s314_s1 = inlined_call_operand.vmem [shape: f32[8,1], index: 1, kind: input, shape index: {}]   ;;  %s315_s2 = inlined_call_operand.hbm [shape: f32[16,8,16], index: 2, kind: output, shape index: {}]  }
   0x1   :  { %8 = vsyncpa [#allocation5], 0  ;;  %s223_s9 = smov [#allocation3]   ;;  %s175_s13 = scalar_lea.hbm %s313_s0, 2048 }
   0x2   :  { %s14_s10 = sshll.u32 %s223_s9, 4  ;;  %p176_p0 = scmp.ne.s32.totalorder %s313_s0, %s175_s13  ;;  %s15_s10 = int_to_ptr.vmem [resolvable:$true] %s14_s10 }
   0x3   :  { %p179_p1 = scmp.lt.u32.totalorder %s175_s13, %s313_s0 }
   0x5   :  { %p181_p2 = pnand %p179_p1, %p176_p0 }
   0x7   :  { %184 = shalt.err (!%p181_p2)
}
   0x8   :  { %s185_s18 = scalar_lea.vmem %s15_s10, 2048  ;;  %p190_p4 = scmp.lt.s32.totalorder %s15_s10, %s15_s10 }
   0x9   :  { %p186_p3 = scmp.ne.s32.totalorder %s15_s10, %s185_s18  ;;  %p191_p5 = scmp.lt.s32.totalorder %s185_s18, %s185_s18 }
   0xb   :  { %p192_p6 = por %p191_p5, %p190_p4 }
   0xd   :  { %p193_p7 = pnand %p192_p6, %p186_p3 }
   0xf   :  { %196 = shalt.err (!%p193_p7)
}
  0x10   :  { %s224_s19 = smov 128   ;;  %s225_s20 = smov 8  }
  0x11   :  { %20 = dma.hbm_to_vmem [thread:$0]  %s313_s0, 2048, %s15_s10, [#allocation4], %s224_s19, %s224_s19, %s225_s20  }
  0x12   :  { %219 = dma.done.wait [#allocation4], 2048  }
  0x13   :  { %220 = vsyncadd [#allocation4], 4294965248  ;;  %vm30_vm0 = vcmask 130048   ;;  %v226_v0 = vmov 0   ;;  %v227_v1 = vmov 0.0   ;;  %v32_v2 = vld [vmem:[%s314_s1] sm:$0xff] }
  0x14   :  { %174 = vset.pattern.permute.xlu0 %v226_v0  ;;  %31 = vst.msk [vmem:[#allocation2] sm:$0xff] %vm30_vm0, %v227_v1  ;;  %v40_v4 = vld [vmem:[#allocation3] sm:$0xff]  ;;  %v47_v9 = vld [vmem:[#allocation3 + $0x8] sm:$0xff]  ;;  %v54_v13 = vld [vmem:[#allocation3 + $0x10] sm:$0xff]  ;;  %s228_s0 = smov [#allocation6]  }
  0x15   :  { %36 = vperm.xlu0 %174, %v32_v2   ;;  %v61_v17 = vld [vmem:[#allocation3 + $0x18] sm:$0xff]  ;;  %v68_v21 = vld [vmem:[#allocation3 + $0x20] sm:$0xff]  ;;  %v75_v25 = vld [vmem:[#allocation3 + $0x28] sm:$0xff]  ;;  %s156_s1 = sshll.u32 %s228_s0, 4  ;;  %s157_s1 = int_to_ptr.vmem [resolvable:$true] %s156_s1 }
  0x16   :  { %v82_v29 = vld [vmem:[#allocation3 + $0x30] sm:$0xff]  ;;  %v89_v33 = vld [vmem:[#allocation3 + $0x38] sm:$0xff]  ;;  %v96_v37 = vld [vmem:[#allocation3 + $0x40] sm:$0xff]  ;;  %s197_s25 = scalar_lea.vmem %s157_s1, 2048  ;;  %p202_p9 = scmp.lt.s32.totalorder %s157_s1, %s157_s1 }
  0x17   :  { %v103_v41 = vld [vmem:[#allocation3 + $0x48] sm:$0xff]  ;;  %v110_v45 = vld [vmem:[#allocation3 + $0x50] sm:$0xff]  ;;  %v117_v49 = vld [vmem:[#allocation3 + $0x58] sm:$0xff]  ;;  %p198_p8 = scmp.ne.s32.totalorder %s157_s1, %s197_s25  ;;  %p203_p10 = scmp.lt.s32.totalorder %s197_s25, %s197_s25 }
  0x18   :  { %v124_v53 = vld [vmem:[#allocation3 + $0x60] sm:$0xff]  ;;  %v131_v57 = vld [vmem:[#allocation3 + $0x68] sm:$0xff]  ;;  %v138_v61 = vld [vmem:[#allocation3 + $0x70] sm:$0xff] }
  0x19   :  { %v145_v1 = vld [vmem:[#allocation3 + $0x78] sm:$0xff]  ;;  %p204_p11 = por %p203_p10, %p202_p9 }
  0x1b   :  { %v33_v3 = vld [vmem:[#allocation2] sm:$0xff]  ;;  %p205_p12 = pnand %p204_p11, %p198_p8 }
  0x94   :  { %v263_v5 = vpop.permute.xlu0 %36 }
  0x95   :  { %v39_v6 = vmul.f32 %v263_v5, %v33_v3 }
  0x97   :  { %v41_v7 = vadd.f32 %v40_v4, %v39_v6 }
  0x99   :  { %v42_v8 = vmax.f32 %v41_v7, 0.0 }
  0x9b   :  { %44 = vst.msk [vmem:[#allocation6] sm:$0xff] %vm30_vm0, %v42_v8  ;;  %v45_v10 = vmul.f32 %v42_v8, %v263_v5 }
  0x9d   :  { %v48_v11 = vadd.f32 %v47_v9, %v45_v10 }
  0x9f   :  { %v49_v12 = vmax.f32 %v48_v11, 0.0 }
  0xa1   :  { %51 = vst.msk [vmem:[#allocation6 + $0x8] sm:$0xff] %vm30_vm0, %v49_v12  ;;  %v52_v14 = vmul.f32 %v49_v12, %v263_v5 }
  0xa3   :  { %v55_v15 = vadd.f32 %v54_v13, %v52_v14 }
  0xa5   :  { %v56_v16 = vmax.f32 %v55_v15, 0.0 }
  0xa7   :  { %58 = vst.msk [vmem:[#allocation6 + $0x10] sm:$0xff] %vm30_vm0, %v56_v16  ;;  %v59_v18 = vmul.f32 %v56_v16, %v263_v5 }
  0xa9   :  { %v62_v19 = vadd.f32 %v61_v17, %v59_v18 }
  0xab   :  { %v63_v20 = vmax.f32 %v62_v19, 0.0 }
  0xad   :  { %65 = vst.msk [vmem:[#allocation6 + $0x18] sm:$0xff] %vm30_vm0, %v63_v20  ;;  %v66_v22 = vmul.f32 %v63_v20, %v263_v5 }
  0xaf   :  { %v69_v23 = vadd.f32 %v68_v21, %v66_v22 }
  0xb1   :  { %v70_v24 = vmax.f32 %v69_v23, 0.0 }
  0xb3   :  { %72 = vst.msk [vmem:[#allocation6 + $0x20] sm:$0xff] %vm30_vm0, %v70_v24  ;;  %v73_v26 = vmul.f32 %v70_v24, %v263_v5 }
  0xb5   :  { %v76_v27 = vadd.f32 %v75_v25, %v73_v26 }
  0xb7   :  { %v77_v28 = vmax.f32 %v76_v27, 0.0 }
  0xb9   :  { %79 = vst.msk [vmem:[#allocation6 + $0x28] sm:$0xff] %vm30_vm0, %v77_v28  ;;  %v80_v30 = vmul.f32 %v77_v28, %v263_v5 }
  0xbb   :  { %v83_v31 = vadd.f32 %v82_v29, %v80_v30 }
  0xbd   :  { %v84_v32 = vmax.f32 %v83_v31, 0.0 }
  0xbf   :  { %86 = vst.msk [vmem:[#allocation6 + $0x30] sm:$0xff] %vm30_vm0, %v84_v32  ;;  %v87_v34 = vmul.f32 %v84_v32, %v263_v5 }
  0xc1   :  { %v90_v35 = vadd.f32 %v89_v33, %v87_v34 }
  0xc3   :  { %v91_v36 = vmax.f32 %v90_v35, 0.0 }
  0xc5   :  { %93 = vst.msk [vmem:[#allocation6 + $0x38] sm:$0xff] %vm30_vm0, %v91_v36  ;;  %v94_v38 = vmul.f32 %v91_v36, %v263_v5 }
  0xc7   :  { %v97_v39 = vadd.f32 %v96_v37, %v94_v38 }
  0xc9   :  { %v98_v40 = vmax.f32 %v97_v39, 0.0 }
  0xcb   :  { %100 = vst.msk [vmem:[#allocation6 + $0x40] sm:$0xff] %vm30_vm0, %v98_v40  ;;  %v101_v42 = vmul.f32 %v98_v40, %v263_v5 }
  0xcd   :  { %v104_v43 = vadd.f32 %v103_v41, %v101_v42 }
  0xcf   :  { %v105_v44 = vmax.f32 %v104_v43, 0.0 }
  0xd1   :  { %107 = vst.msk [vmem:[#allocation6 + $0x48] sm:$0xff] %vm30_vm0, %v105_v44  ;;  %v108_v46 = vmul.f32 %v105_v44, %v263_v5 }
  0xd3   :  { %v111_v47 = vadd.f32 %v110_v45, %v108_v46 }
  0xd5   :  { %v112_v48 = vmax.f32 %v111_v47, 0.0 }
  0xd7   :  { %114 = vst.msk [vmem:[#allocation6 + $0x50] sm:$0xff] %vm30_vm0, %v112_v48  ;;  %v115_v50 = vmul.f32 %v112_v48, %v263_v5 }
  0xd9   :  { %v118_v51 = vadd.f32 %v117_v49, %v115_v50 }
  0xdb   :  { %v119_v52 = vmax.f32 %v118_v51, 0.0 }
  0xdd   :  { %121 = vst.msk [vmem:[#allocation6 + $0x58] sm:$0xff] %vm30_vm0, %v119_v52  ;;  %v122_v54 = vmul.f32 %v119_v52, %v263_v5 }
  0xdf   :  { %v125_v55 = vadd.f32 %v124_v53, %v122_v54 }
  0xe1   :  { %v126_v56 = vmax.f32 %v125_v55, 0.0 }
  0xe3   :  { %128 = vst.msk [vmem:[#allocation6 + $0x60] sm:$0xff] %vm30_vm0, %v126_v56  ;;  %v129_v58 = vmul.f32 %v126_v56, %v263_v5 }
  0xe5   :  { %v132_v59 = vadd.f32 %v131_v57, %v129_v58 }
  0xe7   :  { %v133_v60 = vmax.f32 %v132_v59, 0.0 }
  0xe9   :  { %135 = vst.msk [vmem:[#allocation6 + $0x68] sm:$0xff] %vm30_vm0, %v133_v60  ;;  %v136_v62 = vmul.f32 %v133_v60, %v263_v5 }
  0xeb   :  { %v139_v63 = vadd.f32 %v138_v61, %v136_v62 }
  0xed   :  { %v140_v0 = vmax.f32 %v139_v63, 0.0 }
  0xef   :  { %142 = vst.msk [vmem:[#allocation6 + $0x70] sm:$0xff] %vm30_vm0, %v140_v0  ;;  %v143_v2 = vmul.f32 %v140_v0, %v263_v5 }
  0xf1   :  { %v146_v3 = vadd.f32 %v145_v1, %v143_v2 }
  0xf3   :  { %v147_v4 = vmax.f32 %v146_v3, 0.0 }
  0xf5   :  { %149 = vst.msk [vmem:[#allocation6 + $0x78] sm:$0xff] %vm30_vm0, %v147_v4  ;;  %150 = vst.msk [vmem:[#allocation2] sm:$0xff] %vm30_vm0, %v147_v4 }
  0xf6   :  { %208 = shalt.err (!%p205_p12)
}
  0xf7   :  { %s209_s28 = scalar_lea.hbm %s315_s2, 2048 }
  0xf8   :  { %p210_p13 = scmp.ne.s32.totalorder %s315_s2, %s209_s28  ;;  %p213_p0 = scmp.lt.u32.totalorder %s209_s28, %s315_s2 }
  0xfa   :  { %p215_p1 = pnand %p213_p0, %p210_p13 }
  0xfc   :  { %218 = shalt.err (!%p215_p1)
}
  0xfd   :  { %162 = dma.vmem_to_hbm [thread:$0]  %s157_s1, 2048, %s315_s2, [#allocation5], %s224_s19, %s224_s19, %s225_s20  }
  0xfe   :  { %221 = dma.done.wait [#allocation5], 2048  }
  0xff   :  { %222 = vsyncadd [#allocation5], 4294965248 }
 0x100   :  { %166 = vsyncpa [#allocation4], 1 }
 0x101   :  { %167 = vsyncpa [#allocation5], 1 }

</bundles_post_ra>
